<compile_context>
chip_gen: v5e
topology: v5e:2x2
jax: 0.10.0
libtpu: 0.0.40
codegen_flags: <defaults>
</compile_context>

<pallas_src>
import functools

import jax
import jax.numpy as jnp
from jax import lax
from jax.experimental import pallas as pl
from jax.experimental.pallas import tpu as pltpu


_LANES = 512  # lane-dense tile width (multiple of 128)


def _vmem_capacity_bytes(default=64 * 1024 * 1024):
    # Trace-time query; falls back gracefully off-TPU (e.g. interpret mode).
    try:
        return int(pltpu.get_tpu_info().vmem_capacity_bytes)
    except Exception:
        return default


def _generator_loss_kernel(
    x_A_ref, x_B_ref,
    d_A_ref, d_B_ref,
    g_A_x_A_ref, g_B_x_B_ref,
    g_B_fake_A_ref, g_A_fake_B_ref,
    out_ref,
    acc_ref,
    *, rows: int, tile_rows: int, k_steps: int, n_img: int, n_d: int,
    lambda_param: float, lambda_ident: float, grouped: bool, needs_mask: bool,
):
    k = pl.program_id(0)

    @pl.when(k == 0)
    def _init():
        acc_ref[...] = jnp.zeros_like(acc_ref)

    # Steady state: load x_A / x_B once per tile and reuse for both L1 pairs;
    # fold lambda_ident at accumulate time (one accumulator, VPU-only work).
    x_A = x_A_ref[...].astype(jnp.float32)
    x_B = x_B_ref[...].astype(jnp.float32)
    ident = (jnp.abs(g_A_x_A_ref[...].astype(jnp.float32) - x_A)
             + jnp.abs(g_B_x_B_ref[...].astype(jnp.float32) - x_B))
    cyc = (jnp.abs(g_B_fake_A_ref[...].astype(jnp.float32) - x_B)
           + jnp.abs(g_A_fake_B_ref[...].astype(jnp.float32) - x_A))
    combined = cyc + lambda_ident * ident  # (tile_rows, LANES)

    if needs_mask:
        # Ragged final block: rows past `rows` hold unspecified VMEM data.
        row_idx = k * tile_rows + lax.broadcasted_iota(jnp.int32, combined.shape, 0)
        combined = jnp.where(row_idx < rows, combined, 0.0)

    if grouped:
        # Collapse sublane groups with pure VALU adds into an (8, LANES) acc.
        acc_ref[...] += combined.reshape(-1, 8, combined.shape[-1]).sum(axis=0)
    else:
        acc_ref[...] += combined

    @pl.when(k == k_steps - 1)
    def _finalize():
        # All cross-lane/sublane reduction, 1/N scaling and lambda weighting
        # happen once here. No pl.program_id inside this body.
        l1_total = jnp.sum(acc_ref[...]) * (lambda_param / float(n_img))

        # GAN MSE terms vs ones(1,1,6,6): tiny resident [B,36] blocks.
        d_A = d_A_ref[...].astype(jnp.float32) - 1.0
        d_B = d_B_ref[...].astype(jnp.float32) - 1.0
        gan = (jnp.sum(d_A * d_A) + jnp.sum(d_B * d_B)) * (1.0 / float(n_d))

        total = l1_total + gan
        out_ref[...] = jnp.broadcast_to(total, out_ref.shape).astype(out_ref.dtype)


def generator_loss(x_A, x_B, d_A_fake_A, d_B_fake_B,
                   g_A_x_A, g_B_x_B, g_B_fake_A, g_A_fake_B,
                   *, lambda_param: float, lambda_ident: float,
                   max_tile_rows: int | None = None):
    n_img = int(x_A.size)        # divisor for every L1 mean (all images same shape)
    n_d = int(d_A_fake_A.size)   # broadcast-mean divisor of mse_loss(d, ones(1,1,6,6))

    vmem_cap = _vmem_capacity_bytes()
    big_vmem = vmem_cap >= 100 * 1024 * 1024   # v5e/v6e have 128 MiB; v7x has 64 MiB/TC
    if max_tile_rows is None:
        max_tile_rows = 1024 if big_vmem else 512

    # Lane-dense [rows, 512] slabs. The reshape is copy-free for contiguous
    # inputs when n_img % 512 == 0 (the common case). Only a sub-512 remainder
    # forces a small zero-pad (identical on both operands of every |a-b| pair,
    # so the padded terms cancel exactly).
    lane_pad = (-n_img) % _LANES
    rows = (n_img + lane_pad) // _LANES

    def flat_img(t):
        v = t.reshape(-1)
        if lane_pad:
            v = jnp.pad(v, (0, lane_pad))
        return v.reshape(rows, _LANES)

    if rows <= max_tile_rows:
        tile_rows = rows                     # single full-array block (always legal)
    else:
        tile_rows = max_tile_rows            # multiple of 8 -> (8,128)-aligned block
    k_steps = -(-rows // tile_rows)
    needs_mask = (rows % tile_rows) != 0     # ragged final row-block handled in-kernel
    grouped = (tile_rows % 8 == 0)
    acc_shape = (8, _LANES) if grouped else (tile_rows, _LANES)

    xA, xB, gAxA, gBxB, gBfA, gAfB = (
        flat_img(t) for t in (x_A, x_B, g_A_x_A, g_B_x_B, g_B_fake_A, g_A_fake_B))
    dA = d_A_fake_A.reshape(d_A_fake_A.shape[0], -1)
    dB = d_B_fake_B.reshape(d_B_fake_B.shape[0], -1)

    # 3-deep buffering on the 6 streamed tensors keeps HBM DMAs queued back to
    # back; only worth it when there are enough grid steps to pipeline.
    use_buffered = (k_steps > 2) and hasattr(pl, "Buffered")

    def make_img_spec():
        idx = lambda k: (k, 0)
        if use_buffered:
            try:
                return pl.BlockSpec((tile_rows, _LANES), idx,
                                    pipeline_mode=pl.Buffered(3))
            except TypeError:
                pass
        return pl.BlockSpec((tile_rows, _LANES), idx)

    img_spec = make_img_spec()
    d_spec_A = pl.BlockSpec(dA.shape, lambda k: (0, 0))   # full block, resident
    d_spec_B = pl.BlockSpec(dB.shape, lambda k: (0, 0))   # (no re-DMA per step)
    out_spec = pl.BlockSpec((8, 128), lambda k: (0, 0))

    # VMEM budget: 6 streams x buffer_count x tile + small acc/d/out + headroom,
    # capped per generation (<=48 MiB on 64-MiB-VMEM chips, <=96 MiB otherwise).
    buf_count = 3 if use_buffered else 2
    tile_bytes = tile_rows * _LANES * 4
    vmem_needed = 6 * buf_count * tile_bytes + (4 << 20)
    vmem_ceiling = (96 << 20) if big_vmem else (48 << 20)
    vmem_limit = int(min(vmem_ceiling, max(32 << 20, vmem_needed)))

    kernel = functools.partial(
        _generator_loss_kernel,
        rows=rows, tile_rows=tile_rows, k_steps=int(k_steps),
        n_img=n_img, n_d=n_d,
        lambda_param=float(lambda_param), lambda_ident=float(lambda_ident),
        grouped=grouped, needs_mask=needs_mask,
    )

    partial_out = pl.pallas_call(
        kernel,
        out_shape=jax.ShapeDtypeStruct((8, 128), jnp.float32),
        grid_spec=pltpu.PrefetchScalarGridSpec(
            num_scalar_prefetch=0,
            grid=(int(k_steps),),
            in_specs=[img_spec, img_spec, d_spec_A, d_spec_B,
                      img_spec, img_spec, img_spec, img_spec],
            out_specs=out_spec,
            scratch_shapes=[pltpu.VMEM(acc_shape, jnp.float32)],
        ),
        compiler_params=pltpu.CompilerParams(
            dimension_semantics=("arbitrary",),
            vmem_limit_bytes=vmem_limit,
        ),
    )(xA, xB, dA, dB, gAxA, gBxB, gBfA, gAfB)

    return partial_out[0, 0]


def _reference(x_A, x_B, d_A_fake_A, d_B_fake_B,
               g_A_x_A, g_B_x_B, g_B_fake_A, g_A_fake_B,
               lambda_param, lambda_ident):
    # Pure-JAX reference mirroring the PyTorch forward.
    mse = lambda d: jnp.mean((d.astype(jnp.float32) - 1.0) ** 2)
    l1 = lambda a, b: jnp.mean(jnp.abs(a.astype(jnp.float32) - b.astype(jnp.float32)))
    loss_gan_A = mse(d_A_fake_A)
    loss_gan_B = mse(d_B_fake_B)
    loss_identity_A = l1(g_A_x_A, x_A)
    loss_identity_B = l1(g_B_x_B, x_B)
    loss_cyc_A = l1(g_B_fake_A, x_B)
    loss_cyc_B = l1(g_A_fake_B, x_A)
    return loss_gan_A + loss_gan_B + lambda_param * (
        loss_cyc_A + loss_cyc_B + lambda_ident * (loss_identity_A + loss_identity_B))


if __name__ == "__main__":
    lambda_param, lambda_ident = 10.0, 0.5

    def make_inputs(key, B, C, H, W):
        ks = jax.random.split(key, 8)
        img = lambda k: jax.random.normal(k, (B, C, H, W), jnp.float32)
        dsc = lambda k: jax.random.normal(k, (B, 1, 6, 6), jnp.float32)
        # (x_A, x_B, d_A_fake_A, d_B_fake_B, g_A_x_A, g_B_x_B, g_B_fake_A, g_A_fake_B)
        return (img(ks[0]), img(ks[1]), dsc(ks[2]), dsc(ks[3]),
                img(ks[4]), img(ks[5]), img(ks[6]), img(ks[7]))

    # Case 1: small shapes implied by the module (B=2, C=3, 16x16 images,
    # 6x6 PatchGAN map) -> single full-array block path.
    args1 = make_inputs(jax.random.PRNGKey(0), 2, 3, 16, 16)
    loss1 = jax.block_until_ready(generator_loss(
        *args1, lambda_param=lambda_param, lambda_ident=lambda_ident))
    ref1 = _reference(*args1, lambda_param, lambda_ident)
    assert jnp.allclose(loss1, ref1, rtol=1e-5, atol=1e-5), (loss1, ref1)

    # Case 2: force the multi-step pipelined path (Buffered(3), grouped acc,
    # masked ragged final block) with a tiny tile cap on still-small data.
    args2 = make_inputs(jax.random.PRNGKey(1), 2, 3, 48, 48)
    loss2 = jax.block_until_ready(generator_loss(
        *args2, lambda_param=lambda_param, lambda_ident=lambda_ident,
        max_tile_rows=8))
    ref2 = _reference(*args2, lambda_param, lambda_ident)
    assert jnp.allclose(loss2, ref2, rtol=1e-5, atol=1e-5), (loss2, ref2)

    print("KERNEL_OK")
</pallas_src>

<mosaic_0001>
module attributes {stable_mosaic.version = 11 : i64} {
  func.func @_generator_loss_kernel(%arg0: i32, %arg1: memref<3x512xf32, #tpu.memory_space<vmem>>, %arg2: memref<3x512xf32, #tpu.memory_space<vmem>>, %arg3: memref<2x36xf32, #tpu.memory_space<vmem>>, %arg4: memref<2x36xf32, #tpu.memory_space<vmem>>, %arg5: memref<3x512xf32, #tpu.memory_space<vmem>>, %arg6: memref<3x512xf32, #tpu.memory_space<vmem>>, %arg7: memref<3x512xf32, #tpu.memory_space<vmem>>, %arg8: memref<3x512xf32, #tpu.memory_space<vmem>>, %arg9: memref<8x128xf32, #tpu.memory_space<vmem>>, %arg10: memref<3x512xf32, #tpu.memory_space<vmem>>) attributes {dimension_semantics = [#tpu.dimension_semantics<arbitrary>], iteration_bounds = array<i64: 1>, scalar_prefetch = 0 : i64, scratch_operands = 1 : i64, tpu.core_type = #tpu.core_type<tc>, window_params = [{transform_indices = @transform_0, window_bounds = array<i64: 3, 512>}, {transform_indices = @transform_1, window_bounds = array<i64: 3, 512>}, {pipeline_mode = #tpu.pipeline_mode<synchronous>, transform_indices = @transform_2, window_bounds = array<i64: 2, 36>}, {pipeline_mode = #tpu.pipeline_mode<synchronous>, transform_indices = @transform_3, window_bounds = array<i64: 2, 36>}, {transform_indices = @transform_4, window_bounds = array<i64: 3, 512>}, {transform_indices = @transform_5, window_bounds = array<i64: 3, 512>}, {transform_indices = @transform_6, window_bounds = array<i64: 3, 512>}, {transform_indices = @transform_7, window_bounds = array<i64: 3, 512>}, {pipeline_mode = #tpu.pipeline_mode<synchronous>, transform_indices = @transform_8, window_bounds = array<i64: 8, 128>}]} {
    %c0_i32 = arith.constant 0 : i32
    %0 = arith.cmpi eq, %arg0, %c0_i32 : i32
    %1 = arith.extui %0 : i1 to i32
    %c0_i32_0 = arith.constant 0 : i32
    %2 = arith.cmpi ne, %1, %c0_i32_0 : i32
    scf.if %2 {
      %cst_18 = arith.constant 0.000000e+00 : f32
      %28 = vector.broadcast %cst_18 : f32 to vector<3x512xf32>
      %c0_19 = arith.constant 0 : index
      %c0_20 = arith.constant 0 : index
      %29 = vector.load %arg10[%c0_19, %c0_20] : memref<3x512xf32, #tpu.memory_space<vmem>>, vector<3x512xf32>
      tpu.vector_store %arg10[%c0_19, %c0_20], %28 {strides = array<i32>} : memref<3x512xf32, #tpu.memory_space<vmem>>, vector<3x512xf32>,
    } else {
    }
    %c0 = arith.constant 0 : index
    %c0_1 = arith.constant 0 : index
    %3 = vector.load %arg1[%c0, %c0_1] : memref<3x512xf32, #tpu.memory_space<vmem>>, vector<3x512xf32>
    %c0_2 = arith.constant 0 : index
    %c0_3 = arith.constant 0 : index
    %4 = vector.load %arg2[%c0_2, %c0_3] : memref<3x512xf32, #tpu.memory_space<vmem>>, vector<3x512xf32>
    %c0_4 = arith.constant 0 : index
    %c0_5 = arith.constant 0 : index
    %5 = vector.load %arg5[%c0_4, %c0_5] : memref<3x512xf32, #tpu.memory_space<vmem>>, vector<3x512xf32>
    %6 = arith.subf %5, %3 : vector<3x512xf32>
    %7 = math.absf %6 : vector<3x512xf32>
    %c0_6 = arith.constant 0 : index
    %c0_7 = arith.constant 0 : index
    %8 = vector.load %arg6[%c0_6, %c0_7] : memref<3x512xf32, #tpu.memory_space<vmem>>, vector<3x512xf32>
    %9 = arith.subf %8, %4 : vector<3x512xf32>
    %10 = math.absf %9 : vector<3x512xf32>
    %11 = arith.addf %7, %10 : vector<3x512xf32>
    %c0_8 = arith.constant 0 : index
    %c0_9 = arith.constant 0 : index
    %12 = vector.load %arg7[%c0_8, %c0_9] : memref<3x512xf32, #tpu.memory_space<vmem>>, vector<3x512xf32>
    %13 = arith.subf %12, %4 : vector<3x512xf32>
    %14 = math.absf %13 : vector<3x512xf32>
    %c0_10 = arith.constant 0 : index
    %c0_11 = arith.constant 0 : index
    %15 = vector.load %arg8[%c0_10, %c0_11] : memref<3x512xf32, #tpu.memory_space<vmem>>, vector<3x512xf32>
    %16 = arith.subf %15, %3 : vector<3x512xf32>
    %17 = math.absf %16 : vector<3x512xf32>
    %18 = arith.addf %14, %17 : vector<3x512xf32>
    %cst = arith.constant 5.000000e-01 : f32
    %19 = vector.broadcast %cst : f32 to vector<3x512xf32>
    %20 = arith.mulf %19, %11 : vector<3x512xf32>
    %21 = arith.addf %18, %20 : vector<3x512xf32>
    %c0_12 = arith.constant 0 : index
    %c0_13 = arith.constant 0 : index
    %22 = vector.load %arg10[%c0_12, %c0_13] : memref<3x512xf32, #tpu.memory_space<vmem>>, vector<3x512xf32>
    %23 = arith.addf %22, %21 : vector<3x512xf32>
    %c0_14 = arith.constant 0 : index
    %c0_15 = arith.constant 0 : index
    %24 = vector.load %arg10[%c0_14, %c0_15] : memref<3x512xf32, #tpu.memory_space<vmem>>, vector<3x512xf32>
    tpu.vector_store %arg10[%c0_14, %c0_15], %23 {strides = array<i32>} : memref<3x512xf32, #tpu.memory_space<vmem>>, vector<3x512xf32>,
    %c0_i32_16 = arith.constant 0 : i32
    %25 = arith.cmpi eq, %arg0, %c0_i32_16 : i32
    %26 = arith.extui %25 : i1 to i32
    %c0_i32_17 = arith.constant 0 : i32
    %27 = arith.cmpi ne, %26, %c0_i32_17 : i32
    scf.if %27 {
      %c0_18 = arith.constant 0 : index
      %c0_19 = arith.constant 0 : index
      %28 = vector.load %arg10[%c0_18, %c0_19] : memref<3x512xf32, #tpu.memory_space<vmem>>, vector<3x512xf32>
      %29 = vector.shape_cast %28 : vector<3x512xf32> to vector<1x3x512xf32>
      %cst_20 = arith.constant dense<0.000000e+00> : vector<1xf32>
      %30 = vector.multi_reduction <add>, %29, %cst_20 [1, 2] : vector<1x3x512xf32> to vector<1xf32>
      %31 = vector.shape_cast %30 : vector<1xf32> to vector<1x1x1xf32>
      %32 = vector.extract %31[0, 0, 0] : f32 from vector<1x1x1xf32>
      %cst_21 = arith.constant 0.00651041651 : f32
      %33 = arith.mulf %32, %cst_21 : f32
      %c0_22 = arith.constant 0 : index
      %c0_23 = arith.constant 0 : index
      %34 = vector.load %arg3[%c0_22, %c0_23] : memref<2x36xf32, #tpu.memory_space<vmem>>, vector<2x36xf32>
      %cst_24 = arith.constant 1.000000e+00 : f32
      %35 = vector.broadcast %cst_24 : f32 to vector<2x36xf32>
      %36 = arith.subf %34, %35 : vector<2x36xf32>
      %c0_25 = arith.constant 0 : index
      %c0_26 = arith.constant 0 : index
      %37 = vector.load %arg4[%c0_25, %c0_26] : memref<2x36xf32, #tpu.memory_space<vmem>>, vector<2x36xf32>
      %cst_27 = arith.constant 1.000000e+00 : f32
      %38 = vector.broadcast %cst_27 : f32 to vector<2x36xf32>
      %39 = arith.subf %37, %38 : vector<2x36xf32>
      %40 = arith.mulf %36, %36 : vector<2x36xf32>
      %41 = vector.shape_cast %40 : vector<2x36xf32> to vector<1x2x36xf32>
      %cst_28 = arith.constant dense<0.000000e+00> : vector<1xf32>
      %42 = vector.multi_reduction <add>, %41, %cst_28 [1, 2] : vector<1x2x36xf32> to vector<1xf32>
      %43 = vector.shape_cast %42 : vector<1xf32> to vector<1x1x1xf32>
      %44 = vector.extract %43[0, 0, 0] : f32 from vector<1x1x1xf32>
      %45 = arith.mulf %39, %39 : vector<2x36xf32>
      %46 = vector.shape_cast %45 : vector<2x36xf32> to vector<1x2x36xf32>
      %cst_29 = arith.constant dense<0.000000e+00> : vector<1xf32>
      %47 = vector.multi_reduction <add>, %46, %cst_29 [1, 2] : vector<1x2x36xf32> to vector<1xf32>
      %48 = vector.shape_cast %47 : vector<1xf32> to vector<1x1x1xf32>
      %49 = vector.extract %48[0, 0, 0] : f32 from vector<1x1x1xf32>
      %50 = arith.addf %44, %49 : f32
      %cst_30 = arith.constant 0.013888889 : f32
      %51 = arith.mulf %50, %cst_30 : f32
      %52 = arith.addf %33, %51 : f32
      %53 = vector.broadcast %52 : f32 to vector<8x128xf32>
      %c0_31 = arith.constant 0 : index
      %c0_32 = arith.constant 0 : index
      %54 = vector.load %arg9[%c0_31, %c0_32] : memref<8x128xf32, #tpu.memory_space<vmem>>, vector<8x128xf32>
      tpu.vector_store %arg9[%c0_31, %c0_32], %53 {strides = array<i32>} : memref<8x128xf32, #tpu.memory_space<vmem>>, vector<8x128xf32>,
    } else {
    }
    return
  }
  func.func @transform_0(%arg0: i32) -> (i32, i32) {
    %c0_i32 = arith.constant 0 : i32
    %c0_i32_0 = arith.constant 0 : i32
    return %arg0, %c0_i32 : i32, i32
  }
  func.func @transform_1(%arg0: i32) -> (i32, i32) {
    %c0_i32 = arith.constant 0 : i32
    %c0_i32_0 = arith.constant 0 : i32
    return %arg0, %c0_i32 : i32, i32
  }
  func.func @transform_2(%arg0: i32) -> (i32, i32) {
    %c0_i32 = arith.constant 0 : i32
    %c0_i32_0 = arith.constant 0 : i32
    %c0_i32_1 = arith.constant 0 : i32
    return %c0_i32, %c0_i32_0 : i32, i32
  }
  func.func @transform_3(%arg0: i32) -> (i32, i32) {
    %c0_i32 = arith.constant 0 : i32
    %c0_i32_0 = arith.constant 0 : i32
    %c0_i32_1 = arith.constant 0 : i32
    return %c0_i32, %c0_i32_0 : i32, i32
  }
  func.func @transform_4(%arg0: i32) -> (i32, i32) {
    %c0_i32 = arith.constant 0 : i32
    %c0_i32_0 = arith.constant 0 : i32
    return %arg0, %c0_i32 : i32, i32
  }
  func.func @transform_5(%arg0: i32) -> (i32, i32) {
    %c0_i32 = arith.constant 0 : i32
    %c0_i32_0 = arith.constant 0 : i32
    return %arg0, %c0_i32 : i32, i32
  }
  func.func @transform_6(%arg0: i32) -> (i32, i32) {
    %c0_i32 = arith.constant 0 : i32
    %c0_i32_0 = arith.constant 0 : i32
    return %arg0, %c0_i32 : i32, i32
  }
  func.func @transform_7(%arg0: i32) -> (i32, i32) {
    %c0_i32 = arith.constant 0 : i32
    %c0_i32_0 = arith.constant 0 : i32
    return %arg0, %c0_i32 : i32, i32
  }
  func.func @transform_8(%arg0: i32) -> (i32, i32) {
    %c0_i32 = arith.constant 0 : i32
    %c0_i32_0 = arith.constant 0 : i32
    %c0_i32_1 = arith.constant 0 : i32
    return %c0_i32, %c0_i32_0 : i32, i32
  }
}

</mosaic_0001>

<bundles_post_ra>
// kernel: tpu_custom_call.1
= control target key start
LH: loop header
LB: loop body
LE: loop exit
PB: predicated region body
PF: predicated region fallthrough
CT: control target
= control target key end

     0   :  { %13 = vsyncpa [#allocation4], 0  ;;  %s563_s0 = inlined_call_operand.hbm [shape: f32[3,512], index: 0, kind: input, shape index: {}]   ;;  %s564_s1 = inlined_call_operand.hbm [shape: f32[3,512], index: 1, kind: input, shape index: {}]   ;;  %s565_s2 = inlined_call_operand.hbm [shape: f32[2,36], index: 2, kind: input, shape index: {}]   ;;  %s566_s3 = inlined_call_operand.vmem [shape: f32[2,36], index: 3, kind: input, shape index: {}]   ;;  %s567_s4 = inlined_call_operand.hbm [shape: f32[3,512], index: 4, kind: input, shape index: {}]   ;;  %s568_s5 = inlined_call_operand.hbm [shape: f32[3,512], index: 5, kind: input, shape index: {}]   ;;  %s569_s6 = inlined_call_operand.hbm [shape: f32[3,512], index: 6, kind: input, shape index: {}]   ;;  %s570_s7 = inlined_call_operand.hbm [shape: f32[3,512], index: 7, kind: input, shape index: {}]   ;;  %s571_s8 = inlined_call_operand.hbm [shape: f32[8,128], index: 8, kind: output, shape index: {}]  }
   0x1   :  { %14 = vsyncpa [#allocation7], 0 }
   0x2   :  { %15 = vsyncpa [#allocation10], 0 }
   0x3   :  { %16 = vsyncpa [#allocation13], 0  ;;  %s34_s29 = sshll.u32 %s564_s1, 4  ;;  %s35_s29 = int_to_ptr.hbm [resolvable:$true] %s34_s29 }
   0x4   :  { %17 = vsyncpa [#allocation5], 0  ;;  %s480_s30 = smov [#allocation6]   ;;  %s58_s12 = sshll.u32 %s567_s4, 4  ;;  %s59_s12 = int_to_ptr.hbm [resolvable:$true] %s58_s12 }
   0x5   :  { %s36_s9 = sshll.u32 %s480_s30, 4  ;;  %s481_s13 = smov [#allocation9]   ;;  %s37_s9 = int_to_ptr.vmem [resolvable:$true] %s36_s9 }
   0x6   :  { %39 = dma.hbm_to_vmem [thread:$0]  %s35_s29, 256, %s37_s9, [#allocation7]  }
   0x7   :  { %s60_s14 = sshll.u32 %s481_s13, 4  ;;  %s80_s17 = sshll.u32 %s569_s6, 4  ;;  %s61_s14 = int_to_ptr.vmem [resolvable:$true] %s60_s14  ;;  %s81_s17 = int_to_ptr.hbm [resolvable:$true] %s80_s17 }
   0x8   :  { %63 = dma.hbm_to_vmem [thread:$0]  %s59_s12, 256, %s61_s14, [#allocation10]  }
   0x9   :  { %s23_s19 = sshll.u32 %s563_s0, 4  ;;  %s482_s20 = smov [#allocation12]   ;;  %s24_s19 = int_to_ptr.hbm [resolvable:$true] %s23_s19 }
   0xa   :  { %s82_s21 = sshll.u32 %s482_s20, 4  ;;  %s483_s4 = smov [#allocation3]   ;;  %s83_s21 = int_to_ptr.vmem [resolvable:$true] %s82_s21 }
   0xb   :  { %85 = dma.hbm_to_vmem [thread:$0]  %s81_s17, 256, %s83_s21, [#allocation13]  }
   0xc   :  { %s25_s22 = sshll.u32 %s483_s4, 4  ;;  %s45_s25 = sshll.u32 %s565_s2, 4  ;;  %s26_s22 = int_to_ptr.vmem [resolvable:$true] %s25_s22  ;;  %s46_s25 = int_to_ptr.hbm [resolvable:$true] %s45_s25 }
   0xd   :  { %28 = dma.hbm_to_vmem [thread:$0]  %s24_s19, 256, %s26_s22, [#allocation4]  }
   0xe   :  { %s69_s27 = sshll.u32 %s568_s5, 4  ;;  %s484_s28 = smov [#allocation8]   ;;  %s70_s27 = int_to_ptr.hbm [resolvable:$true] %s69_s27 }
   0xf   :  { %s47_s0 = sshll.u32 %s484_s28, 4  ;;  %s485_s29 = smov [#allocation11]   ;;  %s48_s0 = int_to_ptr.vmem [resolvable:$true] %s47_s0 }
  0x10   :  { %50 = dma.hbm_to_vmem [thread:$0]  %s46_s25, 32, %s48_s0, [#allocation7]  }
  0x11   :  { %s71_s30 = sshll.u32 %s485_s29, 4  ;;  %s91_s11 = sshll.u32 %s570_s7, 4  ;;  %s72_s30 = int_to_ptr.vmem [resolvable:$true] %s71_s30  ;;  %s92_s11 = int_to_ptr.hbm [resolvable:$true] %s91_s11 }
  0x12   :  { %74 = dma.hbm_to_vmem [thread:$0]  %s70_s27, 256, %s72_s30, [#allocation10]  }
  0x13   :  { %s486_s2 = smov [#allocation14]  }
  0x14   :  { %s93_s12 = sshll.u32 %s486_s2, 4  ;;  %s94_s12 = int_to_ptr.vmem [resolvable:$true] %s93_s12 }
  0x15   :  { %96 = dma.hbm_to_vmem [thread:$0]  %s92_s11, 256, %s94_s12, [#allocation13]  }
  0x16   :  { %470 = dma.done.wait [#allocation4], 256  }
  0x17   :  { %471 = vsyncadd [#allocation4], 4294967040 }
  0x18   :  { %472 = dma.done.wait [#allocation7], 288  }
  0x19   :  { %473 = vsyncadd [#allocation7], 4294967008 }
  0x1a   :  { %474 = dma.done.wait [#allocation10], 512  }
  0x1b   :  { %475 = vsyncadd [#allocation10], 4294966784 }
  0x1c   :  { %476 = dma.done.wait [#allocation13], 512  }
  0x1d   :  { %477 = vsyncadd [#allocation13], 4294966784  ;;  %v487_v0 = vmov 0.0   ;;  %v131_v1 = vld [vmem:[#allocation3] sm:$0x77]  ;;  %vm214_vm0 = vcmask 287744  }
  0x1e   :  { %129 = vst [vmem:[#allocation2] sm:$0x77] %v487_v0  ;;  %v132_v2 = vld [vmem:[#allocation3 + $0x8] sm:$0x77]  ;;  %v133_v3 = vld [vmem:[#allocation6] sm:$0x77] }
  0x1f   :  { %130 = vst [vmem:[#allocation2 + $0x8] sm:$0x77] %v487_v0  ;;  %v134_v4 = vld [vmem:[#allocation6 + $0x8] sm:$0x77]  ;;  %v135_v5 = vld [vmem:[#allocation9] sm:$0x77] }
  0x20   :  { %v136_v6 = vld [vmem:[#allocation9 + $0x8] sm:$0x77]  ;;  %v137_v7 = vsub.f32 %v135_v5, %v131_v1  ;;  %v141_v9 = vld [vmem:[#allocation11] sm:$0x77]  ;;  %v142_v10 = vld [vmem:[#allocation11 + $0x8] sm:$0x77] }
  0x21   :  { %v138_v8 = vsub.f32 %v136_v6, %v132_v2  ;;  %v149_v11 = vld [vmem:[#allocation12] sm:$0x77]  ;;  %v143_v12 = vsub.f32 %v141_v9, %v133_v3  ;;  %v144_v13 = vsub.f32 %v142_v10, %v134_v4  ;;  %v150_v14 = vld [vmem:[#allocation12 + $0x8] sm:$0x77]  ;;  %v155_v16 = vld [vmem:[#allocation14] sm:$0x77] }
  0x22   :  { %v151_v15 = vsub.f32 %v149_v11, %v133_v3  ;;  %v156_v17 = vld [vmem:[#allocation14 + $0x8] sm:$0x77]  ;;  %v139_v18 = vand.u32 2147483647, %v137_v7  ;;  %v152_v20 = vsub.f32 %v150_v14, %v134_v4  ;;  %v157_v21 = vsub.f32 %v155_v16, %v131_v1  ;;  %v211_v31 = vld [vmem:[%s566_s3] sm:$0x3] }
  0x23   :  { %v140_v19 = vand.u32 2147483647, %v138_v8  ;;  %v145_v22 = vand.u32 2147483647, %v143_v12  ;;  %v146_v23 = vand.u32 2147483647, %v144_v13  ;;  %v158_v25 = vsub.f32 %v156_v17, %v132_v2 }
  0x24   :  { %v153_v24 = vand.u32 2147483647, %v151_v15  ;;  %v154_v26 = vand.u32 2147483647, %v152_v20  ;;  %v159_v27 = vand.u32 2147483647, %v157_v21 }
  0x25   :  { %v147_v28 = vadd.f32 %v145_v22, %v139_v18  ;;  %v148_v29 = vadd.f32 %v146_v23, %v140_v19  ;;  %v160_v30 = vand.u32 2147483647, %v158_v25  ;;  %v262_v33 = vadd.f32 -1.0, %v211_v31  ;;  %v167_v37 = vld [vmem:[#allocation2] sm:$0x77]  ;;  %s488_s17 = smov [#allocation15]  }
  0x26   :  { %v161_v32 = vadd.f32 %v159_v27, %v153_v24  ;;  %v168_v38 = vld [vmem:[#allocation2 + $0x8] sm:$0x77]  ;;  %vm191_vm1 = vcmask 1042432   ;;  %v209_v55 = vld [vmem:[#allocation8] sm:$0x3]  ;;  %s246_s1 = sshll.u32 %s488_s17, 4  ;;  %s247_s1 = int_to_ptr.vmem [resolvable:$true] %s246_s1 }
  0x27   :  { %v162_v34 = vadd.f32 %v160_v30, %v154_v26  ;;  %v163_v35 = vmul.f32 0.5, %v147_v28  ;;  %v164_v36 = vmul.f32 0.5, %v148_v29  ;;  %v225_v39 = vmul.f32 %v262_v33, %v262_v33  ;;  %s248_s21 = sshll.u32 %s571_s8, 4  ;;  %s249_s21 = int_to_ptr.hbm [resolvable:$true] %s248_s21 }
  0x28   :  { %v261_v58 = vadd.f32 -1.0, %v209_v55 }
  0x29   :  { %v165_v40 = vadd.f32 %v163_v35, %v161_v32  ;;  %v166_v41 = vadd.f32 %v164_v36, %v162_v34  ;;  %v226_v42 = vsel %vm214_vm0, %v225_v39, 0.0 }
  0x2a   :  { %227 = vadd.xlane.f32.xlu1 %v226_v42  ;;  %v213_v60 = vmul.f32 %v261_v58, %v261_v58 }
  0x2b   :  { %v169_v43 = vadd.f32 %v167_v37, %v165_v40  ;;  %v170_v44 = vadd.f32 %v168_v38, %v166_v41 }
  0x2c   :  { %v215_v61 = vsel %vm214_vm0, %v213_v60, 0.0 }
  0x2d   :  { %171 = vst [vmem:[#allocation2] sm:$0x77] %v169_v43 }
  0x2e   :  { %172 = vst [vmem:[#allocation2 + $0x8] sm:$0x77] %v170_v44 }
  0x34   :  { %v176_v45 = vld [vmem:[#allocation2] sm:$0x77] }
  0x35   :  { %v177_v46 = vld [vmem:[#allocation2 + $0x8] sm:$0x77]  ;;  %180 = vst [vmem:[#allocation1] ss:$2 sm:$0xff] %v176_v45 }
  0x36   :  { %182 = vst [vmem:[#allocation1 + $0x10] ss:$2 sm:$0xff] %v177_v46 }
  0x3c   :  { %v183_v47 = vld.sshfl [vmem:[#allocation1] sm:$0xff pattern:$0x75316420]  ;;  %v184_v48 = vld.sshfl [vmem:[#allocation1 + $0x8] sm:$0xff pattern:$0x75316420] }
  0x3d   :  { %v185_v49 = vld.sshfl [vmem:[#allocation1 + $0x10] sm:$0xff pattern:$0x75316420]  ;;  %v186_v50 = vld.sshfl [vmem:[#allocation1 + $0x18] sm:$0xff pattern:$0x75316420] }
  0x3e   :  { %v192_v51 = vsel %vm191_vm1, %v183_v47, 0.0  ;;  %v193_v52 = vsel %vm191_vm1, %v184_v48, 0.0  ;;  %v195_v53 = vsel %vm191_vm1, %v185_v49, 0.0  ;;  %v197_v56 = vsel %vm191_vm1, %v186_v50, 0.0 }
  0x3f   :  { %v194_v54 = vadd.f32 %v193_v52, %v192_v51 }
  0x41   :  { %v196_v57 = vadd.f32 %v195_v53, %v194_v54 }
  0x43   :  { %v198_v59 = vadd.f32 %v197_v56, %v196_v57 }
  0x45   :  { %199 = vadd.xlane.f32.xlu0 %v198_v59 }
  0x4d   :  { %216 = vadd.xlane.f32.xlu0 %v215_v61 }
  0x9d   :  { %v228_v62 = vpop.xlane.xlu1 %227 }
  0x9e   :  { %v229_v0 = vrot.slane %v228_v62, 4 }
  0xa0   :  { %v230_v3 = vadd.f32 %v229_v0, %v228_v62 }
  0xa2   :  { %v231_v6 = vrot.slane %v230_v3, 2 }
  0xa4   :  { %v232_v12 = vadd.f32 %v231_v6, %v230_v3 }
  0xa6   :  { %v233_v15 = vrot.slane %v232_v12, 1 }
  0xa8   :  { %v234_v18 = vadd.f32 %v233_v15, %v232_v12 }
  0xb8   :  { %v200_v63 = vpop.xlane.xlu0 %199 }
  0xb9   :  { %v201_v1 = vrot.slane %v200_v63, 4 }
  0xbb   :  { %v202_v2 = vadd.f32 %v201_v1, %v200_v63 }
  0xbd   :  { %v203_v4 = vrot.slane %v202_v2, 2 }
  0xbf   :  { %v204_v5 = vadd.f32 %v203_v4, %v202_v2 }
  0xc0   :  { %v217_v7 = vpop.xlane.xlu0 %216 }
  0xc1   :  { %v218_v8 = vrot.slane %v217_v7, 4  ;;  %v205_v9 = vrot.slane %v204_v5, 1 }
  0xc3   :  { %v219_v10 = vadd.f32 %v218_v8, %v217_v7  ;;  %v206_v11 = vadd.f32 %v205_v9, %v204_v5 }
  0xc5   :  { %v220_v13 = vrot.slane %v219_v10, 2  ;;  %263 = vpush %v206_v11 }
  0xc7   :  { %v221_v14 = vadd.f32 %v220_v13, %v219_v10 }
  0xc9   :  { %v222_v16 = vrot.slane %v221_v14, 1 }
  0xcb   :  { %v223_v17 = vadd.f32 %v222_v16, %v221_v14 }
  0xcd   :  { %265 = vpush %v223_v17 }
  0xce   :  { %267 = vpush %v234_v18 }
  0xf6   :  { %s264_s3 = spop %263 }
  0xf7   :  { %s208_s16 = smul.f32 0.0065104165, %s264_s3 }
  0xfe   :  { %s266_s13 = spop %265 }
  0xff   :  { %s268_s14 = spop %267 }
 0x100   :  { %s236_s15 = sadd.f32 %s268_s14, %s266_s13 }
 0x102   :  { %s237_s18 = smul.f32 0.013888889, %s236_s15 }
 0x104   :  { %s238_s4 = sadd.f32 %s237_s18, %s208_s16 }
 0x106   :  { %v239_v19 = vstv %s238_s4 }
 0x107   :  { %240 = vst [vmem:[#allocation15] sm:$0xff] %v239_v19 }
 0x108   :  { %251 = dma.vmem_to_hbm [thread:$0]  %s247_s1, 128, %s249_s21, [#allocation5]  }
 0x109   :  { %478 = dma.done.wait [#allocation5], 128  }
 0x10a   :  { %479 = vsyncadd [#allocation5], 4294967168 }
 0x10b   :  { %256 = vsyncpa [#allocation4], 1 }
 0x10c   :  { %257 = vsyncpa [#allocation7], 1 }
 0x10d   :  { %258 = vsyncpa [#allocation10], 1 }
 0x10e   :  { %259 = vsyncpa [#allocation13], 1 }
 0x10f   :  { %260 = vsyncpa [#allocation5], 1 }

</bundles_post_ra>
